<compile_context>
chip_gen: v6e
topology: v6e:2x2x1
jax: 0.10.0
libtpu: 0.0.40
codegen_flags: <defaults>
</compile_context>

<pallas_src>
import functools

import jax
import jax.numpy as jnp
from jax import lax
from jax.experimental import pallas as pl
from jax.experimental.pallas import tpu as pltpu


def _layernorm_kernel(x_ref, g_ref, b_ref, o_ref, *, eps, one_pass):
    # x_ref / o_ref: (B_TILE, C, T_TILE)
    # g_ref / b_ref: (C, 1), already f32, VMEM-resident (constant index_map)
    x = x_ref[...].astype(jnp.float32)
    c = x.shape[1]
    if one_pass:
        # v7x path: single elementwise traversal (sum & sum-of-squares),
        # f32 accumulation.  var = E[x^2] - mean^2, clamped at 0.
        inv_c = jnp.float32(1.0 / c)
        mean = jnp.sum(x, axis=1, keepdims=True) * inv_c
        ex2 = jnp.sum(x * x, axis=1, keepdims=True) * inv_c
        var = jnp.maximum(ex2 - mean * mean, 0.0)
        centered = x - mean
    else:
        # v5e / v6e path (mem-bound): two-pass, numerically safest.
        mean = jnp.mean(x, axis=1, keepdims=True)
        centered = x - mean
        var = jnp.mean(centered * centered, axis=1, keepdims=True)
    inv = lax.rsqrt(var + eps)  # EUP; biased variance, matches F.layer_norm
    # (C, 1) params broadcast over the batch and lane/time axes.
    o_ref[...] = (centered * inv * g_ref[...] + b_ref[...]).astype(o_ref.dtype)


def _chip_config():
    """Generation-aware (tile_budget, vmem_limit, one_pass, two_tc)."""
    # Conservative defaults: safe on v7x (64 MiB physical / 32 MiB scoped VMEM).
    budget = 8 * 1024 * 1024
    vmem_limit = 32 * 1024 * 1024
    one_pass = False
    two_tc = False
    try:
        info = pltpu.get_tpu_info()
        vmem_bytes = int(info.vmem_capacity_bytes)
        if vmem_bytes >= 96 * 1024 * 1024:
            # v5e / v6e: 128 MiB physical VMEM.  Purely HBM-bound here, so the
            # only lever is tile size -> big tile budget + 64 MiB scoped VMEM.
            budget = 28 * 1024 * 1024
            vmem_limit = 64 * 1024 * 1024
        else:
            # v7x-like: keep VMEM footprint modest (2 TCs share the chip) and
            # trim one elementwise pass since VALU is the thin slot there.
            budget = 12 * 1024 * 1024
            vmem_limit = 32 * 1024 * 1024
            one_pass = True
            two_tc = True
    except Exception:
        # Unknown backend / query failed: keep the conservative, correct path.
        pass
    return budget, vmem_limit, one_pass, two_tc


def _pick_tiles(B, C, T, itemsize, budget, two_tc):
    """Pick (b_tile, t_tile): lane-dense T tile + batch blocking for short T."""
    # T tile sized from the *actual* in/out dtype (bf16 gets 2x wider tiles).
    if T <= 256:
        t_tile = T  # block dim == full array dim satisfies the lane rule
    else:
        per_col = 4 * C * itemsize  # 2 double-buffered input + 2 output tiles
        t_tile = (budget // per_col) // 128 * 128
        t_tile = max(128, min(t_tile, 2048))
        t_tile = min(t_tile, pl.cdiv(T, 128) * 128)
    n_t = pl.cdiv(T, t_tile)

    # Batch blocking when T is short: amortize the ~0.35us per-step overhead
    # and issue larger DMAs.
    b_tile = 1
    if n_t == 1 and B > 1:
        per_row = 4 * C * t_tile * itemsize
        b_tile = int(max(1, min(B, budget // max(per_row, 1))))

    # v7x megacore: make sure both TensorCores get at least one grid step.
    if two_tc and pl.cdiv(B, b_tile) * n_t < 2:
        if b_tile > 1:
            b_tile = max(1, (b_tile + 1) // 2)
        elif t_tile > 128 and t_tile % 256 == 0:
            t_tile //= 2
    return b_tile, t_tile


def layer_norm_pallas(x, gamma, beta, eps=1e-5, *, t_tile=None, b_tile=None):
    """x: (B, C, T) — PyTorch NCT convention.  Normalizes over C."""
    B, C, T = x.shape
    itemsize = jnp.dtype(x.dtype).itemsize
    budget, vmem_limit, one_pass, two_tc = _chip_config()
    auto_b, auto_t = _pick_tiles(B, C, T, itemsize, budget, two_tc)
    if t_tile is None:
        t_tile = auto_t
    if b_tile is None:
        b_tile = auto_b

    n_b = pl.cdiv(B, b_tile)
    n_t = pl.cdiv(T, t_tile)
    grid = (n_b, n_t)

    # Pre-cast params to f32 in the wrapper so no per-step casts run in the body.
    g2 = gamma.reshape(C, 1).astype(jnp.float32)
    b2 = beta.reshape(C, 1).astype(jnp.float32)

    kernel = functools.partial(_layernorm_kernel, eps=eps, one_pass=one_pass)

    # Deepen the input pipeline when a large C forces narrow T tiles: the
    # per-block DMA is then many short strided rows, so extra buffering hides
    # descriptor/latency gaps (cheap in VMEM at those tile sizes).
    deep = n_t > 2 and t_tile <= 256 and C >= 512
    x_spec_kwargs = {"pipeline_mode": pl.Buffered(3)} if deep else {}

    in_specs = [
        pl.BlockSpec((b_tile, C, t_tile), lambda b, t: (b, 0, t), **x_spec_kwargs),
        pl.BlockSpec((C, 1), lambda b, t: (0, 0)),
        pl.BlockSpec((C, 1), lambda b, t: (0, 0)),
    ]
    out_spec = pl.BlockSpec((b_tile, C, t_tile), lambda b, t: (b, 0, t))

    return pl.pallas_call(
        kernel,
        out_shape=jax.ShapeDtypeStruct((B, C, T), x.dtype),
        grid_spec=pltpu.PrefetchScalarGridSpec(
            num_scalar_prefetch=0,
            grid=grid,
            in_specs=in_specs,
            out_specs=out_spec,
        ),
        compiler_params=pltpu.CompilerParams(
            # Both grid axes are independent -> shard across TCs on v7x.
            dimension_semantics=("parallel", "parallel"),
            vmem_limit_bytes=vmem_limit,
        ),
    )(x, g2, b2)


def layer_norm_ref(x, gamma, beta, eps=1e-5):
    # Pure-JAX reference matching the PyTorch module semantics.
    xt = jnp.transpose(x, (0, 2, 1))  # (B, T, C)
    mean = jnp.mean(xt, axis=-1, keepdims=True)
    var = jnp.mean((xt - mean) ** 2, axis=-1, keepdims=True)
    y = (xt - mean) / jnp.sqrt(var + eps) * gamma + beta
    return jnp.transpose(y, (0, 2, 1))


if __name__ == "__main__":
    key = jax.random.PRNGKey(0)
    kx, kg, kb = jax.random.split(key, 3)

    B, C, T = 2, 32, 16
    x = jax.random.normal(kx, (B, C, T), dtype=jnp.float32)

    # Learnable params (init ones/zeros in the module); perturb them so the
    # affine transform is actually exercised by the check.
    gamma = jnp.ones((C,), jnp.float32) + 0.1 * jax.random.normal(kg, (C,), jnp.float32)
    beta = jnp.zeros((C,), jnp.float32) + 0.1 * jax.random.normal(kb, (C,), jnp.float32)

    out = layer_norm_pallas(x, gamma, beta, eps=1e-5)
    out = jax.block_until_ready(out)

    ref = layer_norm_ref(x, gamma, beta, eps=1e-5)
    assert out.shape == (B, C, T)
    assert jnp.allclose(out, ref, atol=1e-5, rtol=1e-5)

    print("KERNEL_OK")
</pallas_src>

<mosaic_0001>
module attributes {stable_mosaic.version = 11 : i64} {
  func.func @_layernorm_kernel(%arg0: i32, %arg1: i32, %arg2: memref<2x32x16xf32, #tpu.memory_space<vmem>>, %arg3: memref<32x1xf32, #tpu.memory_space<vmem>>, %arg4: memref<32x1xf32, #tpu.memory_space<vmem>>, %arg5: memref<2x32x16xf32, #tpu.memory_space<vmem>>) attributes {dimension_semantics = [#tpu.dimension_semantics<parallel>, #tpu.dimension_semantics<parallel>], iteration_bounds = array<i64: 1, 1>, scalar_prefetch = 0 : i64, scratch_operands = 0 : i64, tpu.core_type = #tpu.core_type<tc>, window_params = [{transform_indices = @transform_0, window_bounds = array<i64: 2, 32, 16>}, {pipeline_mode = #tpu.pipeline_mode<synchronous>, transform_indices = @transform_1, window_bounds = array<i64: 32, 1>}, {pipeline_mode = #tpu.pipeline_mode<synchronous>, transform_indices = @transform_2, window_bounds = array<i64: 32, 1>}, {transform_indices = @transform_3, window_bounds = array<i64: 2, 32, 16>}]} {
    %c0 = arith.constant 0 : index
    %c0_0 = arith.constant 0 : index
    %c0_1 = arith.constant 0 : index
    %0 = vector.load %arg2[%c0, %c0_0, %c0_1] : memref<2x32x16xf32, #tpu.memory_space<vmem>>, vector<2x32x16xf32>
    %cst = arith.constant dense<0.000000e+00> : vector<2x16xf32>
    %1 = vector.multi_reduction <add>, %0, %cst [1] : vector<2x32x16xf32> to vector<2x16xf32>
    %2 = vector.shape_cast %1 : vector<2x16xf32> to vector<2x1x16xf32>
    %cst_2 = arith.constant 3.200000e+01 : f32
    %3 = vector.broadcast %cst_2 : f32 to vector<2x1x16xf32>
    %4 = arith.divf %2, %3 : vector<2x1x16xf32>
    %5 = vector.broadcast %4 : vector<2x1x16xf32> to vector<2x32x16xf32>
    %6 = arith.subf %0, %5 : vector<2x32x16xf32>
    %7 = arith.mulf %6, %6 : vector<2x32x16xf32>
    %cst_3 = arith.constant dense<0.000000e+00> : vector<2x16xf32>
    %8 = vector.multi_reduction <add>, %7, %cst_3 [1] : vector<2x32x16xf32> to vector<2x16xf32>
    %9 = vector.shape_cast %8 : vector<2x16xf32> to vector<2x1x16xf32>
    %cst_4 = arith.constant 3.200000e+01 : f32
    %10 = vector.broadcast %cst_4 : f32 to vector<2x1x16xf32>
    %11 = arith.divf %9, %10 : vector<2x1x16xf32>
    %cst_5 = arith.constant 9.99999974E-6 : f32
    %12 = vector.broadcast %cst_5 : f32 to vector<2x1x16xf32>
    %13 = arith.addf %11, %12 : vector<2x1x16xf32>
    %14 = math.rsqrt %13 : vector<2x1x16xf32>
    %15 = vector.broadcast %14 : vector<2x1x16xf32> to vector<2x32x16xf32>
    %16 = arith.mulf %6, %15 : vector<2x32x16xf32>
    %c0_6 = arith.constant 0 : index
    %c0_7 = arith.constant 0 : index
    %17 = vector.load %arg3[%c0_6, %c0_7] : memref<32x1xf32, #tpu.memory_space<vmem>>, vector<32x1xf32>
    %18 = vector.shape_cast %17 : vector<32x1xf32> to vector<1x32x1xf32>
    %19 = vector.broadcast %18 : vector<1x32x1xf32> to vector<2x32x16xf32>
    %20 = arith.mulf %16, %19 : vector<2x32x16xf32>
    %c0_8 = arith.constant 0 : index
    %c0_9 = arith.constant 0 : index
    %21 = vector.load %arg4[%c0_8, %c0_9] : memref<32x1xf32, #tpu.memory_space<vmem>>, vector<32x1xf32>
    %22 = vector.shape_cast %21 : vector<32x1xf32> to vector<1x32x1xf32>
    %23 = vector.broadcast %22 : vector<1x32x1xf32> to vector<2x32x16xf32>
    %24 = arith.addf %20, %23 : vector<2x32x16xf32>
    %c0_10 = arith.constant 0 : index
    %c0_11 = arith.constant 0 : index
    %c0_12 = arith.constant 0 : index
    %25 = vector.load %arg5[%c0_10, %c0_11, %c0_12] : memref<2x32x16xf32, #tpu.memory_space<vmem>>, vector<2x32x16xf32>
    tpu.vector_store %arg5[%c0_10, %c0_11, %c0_12], %24 {strides = array<i32>} : memref<2x32x16xf32, #tpu.memory_space<vmem>>, vector<2x32x16xf32>,
    return
  }
  func.func @transform_0(%arg0: i32, %arg1: i32) -> (i32, i32, i32) {
    %c0_i32 = arith.constant 0 : i32
    %c0_i32_0 = arith.constant 0 : i32
    return %arg0, %c0_i32, %arg1 : i32, i32, i32
  }
  func.func @transform_1(%arg0: i32, %arg1: i32) -> (i32, i32) {
    %c0_i32 = arith.constant 0 : i32
    %c0_i32_0 = arith.constant 0 : i32
    %c0_i32_1 = arith.constant 0 : i32
    return %c0_i32, %c0_i32_0 : i32, i32
  }
  func.func @transform_2(%arg0: i32, %arg1: i32) -> (i32, i32) {
    %c0_i32 = arith.constant 0 : i32
    %c0_i32_0 = arith.constant 0 : i32
    %c0_i32_1 = arith.constant 0 : i32
    return %c0_i32, %c0_i32_0 : i32, i32
  }
  func.func @transform_3(%arg0: i32, %arg1: i32) -> (i32, i32, i32) {
    %c0_i32 = arith.constant 0 : i32
    %c0_i32_0 = arith.constant 0 : i32
    return %arg0, %c0_i32, %arg1 : i32, i32, i32
  }
}

</mosaic_0001>

<bundles_post_ra>
// kernel: tpu_custom_call.1
= control target key start
LH: loop header
LB: loop body
LE: loop exit
PB: predicated region body
PF: predicated region fallthrough
CT: control target
= control target key end

     0   :  { %v191_v0 = vmov 0   ;;  %vm22_vm0 = vcmask 130048   ;;  %s308_s1 = inlined_call_operand.vmem [shape: f32[32,1], index: 1, kind: input, shape index: {}]   ;;  %s309_s2 = inlined_call_operand.vmem [shape: f32[32,1], index: 2, kind: input, shape index: {}]   ;;  %s310_s0 = inlined_call_operand.vmem [shape: f32[2,32,16], index: 0, kind: input, shape index: {}]   ;;  %s311_s3 = inlined_call_operand.vmem [shape: f32[2,32,16], index: 3, kind: output, shape index: {}]  }
   0x1   :  { %186 = vset.pattern.permute.xlu1 %v191_v0  ;;  %185 = vset.pattern.permute.xlu0 %v191_v0  ;;  %v110_v1 = vld [vmem:[%s308_s1 + $0x10] sm:$0xff]  ;;  %v108_v2 = vld [vmem:[%s308_s1] sm:$0xff]  ;;  %v111_v3 = vld [vmem:[%s308_s1 + $0x18] sm:$0xff] }
   0x2   :  { %124 = vperm.xlu1 %186, %v110_v1   ;;  %114 = vperm.xlu0 %185, %v108_v2   ;;  %v109_v4 = vld [vmem:[%s308_s1 + $0x8] sm:$0xff]  ;;  %v140_v6 = vld [vmem:[%s309_s2] sm:$0xff]  ;;  %v143_v7 = vld [vmem:[%s309_s2 + $0x18] sm:$0xff] }
   0x3   :  { %v141_v5 = vld [vmem:[%s309_s2 + $0x8] sm:$0xff]  ;;  %v14_v8 = vld [vmem:[%s310_s0] sm:$0xff]  ;;  %v142_v10 = vld [vmem:[%s309_s2 + $0x10] sm:$0xff] }
   0x4   :  { %v15_v9 = vld [vmem:[%s310_s0 + $0x8] sm:$0xff]  ;;  %v18_v11 = vld [vmem:[%s310_s0 + $0x20] sm:$0xff]  ;;  %v23_v13 = vsel %vm22_vm0, %v14_v8, 0.0  ;;  %v16_v15 = vld [vmem:[%s310_s0 + $0x10] sm:$0xff] }
   0x5   :  { %v19_v12 = vld [vmem:[%s310_s0 + $0x28] sm:$0xff]  ;;  %v24_v14 = vsel %vm22_vm0, %v15_v9, 0.0  ;;  %v36_v16 = vsel %vm22_vm0, %v18_v11, 0.0  ;;  %v20_v18 = vld [vmem:[%s310_s0 + $0x30] sm:$0xff]  ;;  %v26_v20 = vsel %vm22_vm0, %v16_v15, 0.0  ;;  %v17_v22 = vld [vmem:[%s310_s0 + $0x18] sm:$0xff] }
   0x6   :  { %129 = vperm.xlu1 %186, %v111_v3   ;;  %119 = vperm.xlu0 %185, %v109_v4   ;;  %v37_v17 = vsel %vm22_vm0, %v19_v12, 0.0  ;;  %v25_v19 = vadd.f32 %v24_v14, %v23_v13  ;;  %v39_v23 = vsel %vm22_vm0, %v20_v18, 0.0  ;;  %v21_v24 = vld [vmem:[%s310_s0 + $0x38] sm:$0xff]  ;;  %v28_v26 = vsel %vm22_vm0, %v17_v22, 0.0 }
   0x7   :  { %v38_v21 = vadd.f32 %v37_v17, %v36_v16  ;;  %v41_v28 = vsel %vm22_vm0, %v21_v24, 0.0 }
   0x8   :  { %v27_v25 = vadd.f32 %v26_v20, %v25_v19 }
   0x9   :  { %v40_v27 = vadd.f32 %v39_v23, %v38_v21 }
   0xa   :  { %151 = vperm.xlu1 %186, %v141_v5   ;;  %146 = vperm.xlu0 %185, %v140_v6   ;;  %v29_v29 = vadd.f32 %v28_v26, %v27_v25 }
   0xb   :  { %v42_v30 = vadd.f32 %v41_v28, %v40_v27 }
   0xc   :  { %v30_v31 = vrot.slane %v29_v29, 4 }
   0xd   :  { %v43_v32 = vrot.slane %v42_v30, 4 }
   0xe   :  { %161 = vperm.xlu1 %186, %v143_v7   ;;  %156 = vperm.xlu0 %185, %v142_v10   ;;  %v31_v33 = vadd.f32 %v30_v31, %v29_v29 }
   0xf   :  { %v44_v34 = vadd.f32 %v43_v32, %v42_v30 }
  0x10   :  { %v32_v35 = vrot.slane %v31_v33, 2 }
  0x11   :  { %v45_v36 = vrot.slane %v44_v34, 2 }
  0x12   :  { %v33_v37 = vadd.f32 %v32_v35, %v31_v33 }
  0x13   :  { %v46_v38 = vadd.f32 %v45_v36, %v44_v34 }
  0x14   :  { %v34_v39 = vrot.slane %v33_v37, 1 }
  0x15   :  { %v47_v40 = vrot.slane %v46_v38, 1 }
  0x16   :  { %v35_v41 = vadd.f32 %v34_v39, %v33_v37 }
  0x17   :  { %v48_v42 = vadd.f32 %v47_v40, %v46_v38 }
  0x18   :  { %v50_v43 = vmul.f32 0.03125, %v35_v41 }
  0x19   :  { %v51_v44 = vmul.f32 0.03125, %v48_v42 }
  0x1a   :  { %v52_v45 = vsub.f32 %v14_v8, %v50_v43  ;;  %v53_v46 = vsub.f32 %v15_v9, %v50_v43  ;;  %v54_v49 = vsub.f32 %v16_v15, %v50_v43  ;;  %v55_v55 = vsub.f32 %v17_v22, %v50_v43 }
  0x1b   :  { %v56_v47 = vsub.f32 %v18_v11, %v51_v44  ;;  %v57_v48 = vsub.f32 %v19_v12, %v51_v44  ;;  %v58_v52 = vsub.f32 %v20_v18, %v51_v44  ;;  %v59_v59 = vsub.f32 %v21_v24, %v51_v44 }
  0x1c   :  { %v60_v50 = vmul.f32 %v52_v45, %v52_v45  ;;  %v61_v51 = vmul.f32 %v53_v46, %v53_v46  ;;  %v62_v56 = vmul.f32 %v54_v49, %v54_v49  ;;  %v63_v0 = vmul.f32 %v55_v55, %v55_v55 }
  0x1d   :  { %v64_v53 = vmul.f32 %v56_v47, %v56_v47  ;;  %v65_v54 = vmul.f32 %v57_v48, %v57_v48  ;;  %v66_v60 = vmul.f32 %v58_v52, %v58_v52  ;;  %v67_v3 = vmul.f32 %v59_v59, %v59_v59 }
  0x1e   :  { %v68_v57 = vsel %vm22_vm0, %v60_v50, 0.0  ;;  %v69_v58 = vsel %vm22_vm0, %v61_v51, 0.0  ;;  %v71_v1 = vsel %vm22_vm0, %v62_v56, 0.0  ;;  %v73_v6 = vsel %vm22_vm0, %v63_v0, 0.0 }
  0x1f   :  { %v81_v61 = vsel %vm22_vm0, %v64_v53, 0.0  ;;  %v82_v62 = vsel %vm22_vm0, %v65_v54, 0.0  ;;  %v70_v63 = vadd.f32 %v69_v58, %v68_v57  ;;  %v84_v4 = vsel %vm22_vm0, %v66_v60, 0.0 }
  0x20   :  { %v83_v2 = vadd.f32 %v82_v62, %v81_v61  ;;  %v86_v8 = vsel %vm22_vm0, %v67_v3, 0.0 }
  0x21   :  { %v72_v5 = vadd.f32 %v71_v1, %v70_v63 }
  0x22   :  { %v85_v7 = vadd.f32 %v84_v4, %v83_v2 }
  0x23   :  { %v74_v9 = vadd.f32 %v73_v6, %v72_v5 }
  0x24   :  { %v87_v10 = vadd.f32 %v86_v8, %v85_v7 }
  0x25   :  { %v75_v11 = vrot.slane %v74_v9, 4 }
  0x26   :  { %v88_v12 = vrot.slane %v87_v10, 4 }
  0x27   :  { %v76_v13 = vadd.f32 %v75_v11, %v74_v9 }
  0x28   :  { %v89_v14 = vadd.f32 %v88_v12, %v87_v10 }
  0x29   :  { %v77_v15 = vrot.slane %v76_v13, 2 }
  0x2a   :  { %v90_v16 = vrot.slane %v89_v14, 2 }
  0x2b   :  { %v78_v17 = vadd.f32 %v77_v15, %v76_v13 }
  0x2c   :  { %v91_v18 = vadd.f32 %v90_v16, %v89_v14 }
  0x2d   :  { %v79_v19 = vrot.slane %v78_v17, 1 }
  0x2e   :  { %v92_v20 = vrot.slane %v91_v18, 1 }
  0x2f   :  { %v80_v21 = vadd.f32 %v79_v19, %v78_v17 }
  0x30   :  { %v93_v22 = vadd.f32 %v92_v20, %v91_v18 }
  0x31   :  { %v94_v23 = vmul.f32 0.03125, %v80_v21 }
  0x32   :  { %v95_v24 = vmul.f32 0.03125, %v93_v22 }
  0x33   :  { %v96_v25 = vadd.f32 1e-05, %v94_v23 }
  0x34   :  { %v97_v26 = vadd.f32 1e-05, %v95_v24 }
  0x35   :  { %187 = vrsqrt.f32 %v96_v25 }
  0x36   :  { %189 = vrsqrt.f32 %v97_v26 }
  0x42   :  { %v188_v27 = vpop.eup %187 }
  0x43   :  { %v190_v28 = vpop.eup %189  ;;  %v100_v31 = vmul.f32 %v188_v27, %v52_v45  ;;  %v101_v33 = vmul.f32 %v188_v27, %v53_v46  ;;  %v102_v37 = vmul.f32 %v188_v27, %v54_v49  ;;  %v103_v39 = vmul.f32 %v188_v27, %v55_v55 }
  0x44   :  { %v104_v32 = vmul.f32 %v190_v28, %v56_v47  ;;  %v105_v34 = vmul.f32 %v190_v28, %v57_v48  ;;  %v106_v38 = vmul.f32 %v190_v28, %v58_v52  ;;  %v107_v40 = vmul.f32 %v190_v28, %v59_v59 }
  0x7d   :  { %v125_v29 = vpop.permute.xlu1 %124  ;;  %v115_v30 = vpop.permute.xlu0 %114 }
  0x7e   :  { %v132_v41 = vmul.f32 %v115_v30, %v100_v31  ;;  %v136_v42 = vmul.f32 %v115_v30, %v104_v32  ;;  %v134_v45 = vmul.f32 %v125_v29, %v102_v37  ;;  %v138_v47 = vmul.f32 %v125_v29, %v106_v38 }
  0x81   :  { %v130_v35 = vpop.permute.xlu1 %129  ;;  %v120_v36 = vpop.permute.xlu0 %119 }
  0x82   :  { %v133_v43 = vmul.f32 %v120_v36, %v101_v33  ;;  %v137_v44 = vmul.f32 %v120_v36, %v105_v34  ;;  %v135_v46 = vmul.f32 %v130_v35, %v103_v39  ;;  %v139_v48 = vmul.f32 %v130_v35, %v107_v40 }
  0x85   :  { %v152_v50 = vpop.permute.xlu1 %151  ;;  %v147_v51 = vpop.permute.xlu0 %146 }
  0x86   :  { %v165_v53 = vadd.f32 %v152_v50, %v133_v43  ;;  %v169_v54 = vadd.f32 %v152_v50, %v137_v44  ;;  %v164_v56 = vadd.f32 %v147_v51, %v132_v41  ;;  %v168_v57 = vadd.f32 %v147_v51, %v136_v42 }
  0x88   :  { %173 = vst.msk [vmem:[%s311_s3 + $0x8] sm:$0xff] %vm22_vm0, %v165_v53  ;;  %177 = vst.msk [vmem:[%s311_s3 + $0x28] sm:$0xff] %vm22_vm0, %v169_v54 }
  0x89   :  { %172 = vst.msk [vmem:[%s311_s3] sm:$0xff] %vm22_vm0, %v164_v56  ;;  %176 = vst.msk [vmem:[%s311_s3 + $0x20] sm:$0xff] %vm22_vm0, %v168_v57  ;;  %v162_v49 = vpop.permute.xlu1 %161  ;;  %v157_v52 = vpop.permute.xlu0 %156 }
  0x8a   :  { %v167_v55 = vadd.f32 %v162_v49, %v135_v46  ;;  %v171_v58 = vadd.f32 %v162_v49, %v139_v48  ;;  %v166_v59 = vadd.f32 %v157_v52, %v134_v45  ;;  %v170_v60 = vadd.f32 %v157_v52, %v138_v47 }
  0x8c   :  { %175 = vst.msk [vmem:[%s311_s3 + $0x18] sm:$0xff] %vm22_vm0, %v167_v55  ;;  %179 = vst.msk [vmem:[%s311_s3 + $0x38] sm:$0xff] %vm22_vm0, %v171_v58 }
  0x8d   :  { %174 = vst.msk [vmem:[%s311_s3 + $0x10] sm:$0xff] %vm22_vm0, %v166_v59  ;;  %178 = vst.msk [vmem:[%s311_s3 + $0x30] sm:$0xff] %vm22_vm0, %v170_v60 }

</bundles_post_ra>
